<compile_context>
chip_gen: v5e
topology: v5e:2x2
jax: 0.10.0
libtpu: 0.0.40
codegen_flags: <defaults>
</compile_context>

<pallas_src>
import functools
import math

import jax
import jax.numpy as jnp
from jax import lax
from jax.experimental import pallas as pl
from jax.experimental.pallas import tpu as pltpu

OBS_DIM = 17          # HalfCheetah-v4 observation dim
ACTION_DIM = 6        # HalfCheetah-v4 action dim
HIDDEN = 256
NUM_COMPONENTS = 5
LOG_STD_MIN, LOG_STD_MAX = -5.0, 2.0

# --- fused head slab lane layout (padded to 128 lanes for lane-dense stores) ---
MIX_OFF, MIX_END = 0, NUM_COMPONENTS                                        # [0, 5)
MEAN_OFF, MEAN_END = MIX_END, MIX_END + ACTION_DIM                          # [5, 11)
LOGSTD_OFF, LOGSTD_END = MEAN_END, MEAN_END + ACTION_DIM                    # [11, 17)
MOGMEAN_OFF, MOGMEAN_END = LOGSTD_END, LOGSTD_END + NUM_COMPONENTS * ACTION_DIM   # [17, 47)
MOGLS_OFF, MOGLS_END = MOGMEAN_END, MOGMEAN_END + NUM_COMPONENTS * ACTION_DIM     # [47, 77)
HEAD_WIDTH = 128

DEFAULT_TILE_B = 256  # good for v6e/v7x MXU (256-wide); 128 already full on v5e


def _round_up(x, m):
    return ((x + m - 1) // m) * m


def _mog_actor_kernel(x_ref, w1_ref, b1_ref, w2_ref, b2_ref, wh_ref, bh_ref, out_ref):
    x = x_ref[...]

    # --- feature trunk: fc1 -> relu -> fc2 -> relu (MXU matmuls, f32 acc) ---
    h = jnp.dot(x, w1_ref[...], preferred_element_type=jnp.float32) + b1_ref[...]
    h = jnp.maximum(h, 0.0)
    h = jnp.dot(h, w2_ref[...], preferred_element_type=jnp.float32) + b2_ref[...]
    h = jnp.maximum(h, 0.0)

    # --- all five heads as ONE full-width matmul: (TB, 256) @ (256, 128) ---
    z = jnp.dot(h, wh_ref[...], preferred_element_type=jnp.float32) + bh_ref[...]

    lane = lax.broadcasted_iota(jnp.int32, z.shape, 1)
    mix_mask = lane < MIX_END
    logstd_mask = (lane >= LOGSTD_OFF) & (lane < LOGSTD_END)
    mogls_mask = (lane >= MOGLS_OFF) & (lane < MOGLS_END)

    # --- mixture weights: masked softmax over the 5 mix lanes (lane-dense) ---
    logits = jnp.where(mix_mask, z, -jnp.inf)
    m = jnp.max(logits, axis=-1, keepdims=True)
    e = jnp.exp(logits - m)                       # exp(-inf) = 0 on masked lanes
    w = e / jnp.sum(e, axis=-1, keepdims=True)
    w = jnp.where(mix_mask, jnp.clip(w, 1e-6, 1.0), 0.0)
    w = w / jnp.sum(w, axis=-1, keepdims=True)

    # --- log_std head: tanh squash then affine rescale to [-5, 2] ---
    t = LOG_STD_MIN + 0.5 * (LOG_STD_MAX - LOG_STD_MIN) * (jnp.tanh(z) + 1.0)

    # --- mog log-std head: clamp to [-5, 2] ---
    c = jnp.clip(z, LOG_STD_MIN, LOG_STD_MAX)

    # mean / mog_means lanes stay as z (identity heads)
    out = jnp.where(mix_mask, w, z)
    out = jnp.where(logstd_mask, t, out)
    out = jnp.where(mogls_mask, c, out)
    out_ref[...] = out                            # single lane-dense (TB, 128) store


@functools.partial(jax.jit, static_argnames=("tile_b",))
def mog_actor_forward(x, packed, tile_b=DEFAULT_TILE_B):
    """MoGActor forward pass: one Pallas call, batch-gridded, weights VMEM-resident."""
    batch = x.shape[0]
    tb = min(tile_b, _round_up(max(batch, 1), 8))   # sublane-aligned batch tile
    padded = _round_up(batch, tb)
    if padded != batch:
        x = jnp.pad(x, ((0, padded - batch), (0, 0)))
    grid = padded // tb

    const = lambda i: (0, 0)  # weights/biases: same block every grid step -> resident
    out = pl.pallas_call(
        _mog_actor_kernel,
        out_shape=jax.ShapeDtypeStruct((padded, HEAD_WIDTH), jnp.float32),
        grid_spec=pltpu.PrefetchScalarGridSpec(
            num_scalar_prefetch=0,
            grid=(grid,),
            in_specs=[
                pl.BlockSpec((tb, OBS_DIM), lambda i: (i, 0)),     # x (per-step)
                pl.BlockSpec((OBS_DIM, HIDDEN), const),            # w1
                pl.BlockSpec((1, HIDDEN), const),                  # b1
                pl.BlockSpec((HIDDEN, HIDDEN), const),             # w2
                pl.BlockSpec((1, HIDDEN), const),                  # b2
                pl.BlockSpec((HIDDEN, HEAD_WIDTH), const),         # fused head weights
                pl.BlockSpec((1, HEAD_WIDTH), const),              # fused head biases
            ],
            out_specs=pl.BlockSpec((tb, HEAD_WIDTH), lambda i: (i, 0)),
        ),
        compiler_params=pltpu.CompilerParams(dimension_semantics=("parallel",)),
    )(x, packed["w1"], packed["b1"], packed["w2"], packed["b2"],
      packed["w_heads"], packed["b_heads"])

    # View-only glue: slice lane ranges of the lane-dense slab, drop batch padding.
    mix_w = out[:batch, MIX_OFF:MIX_END]
    mean = out[:batch, MEAN_OFF:MEAN_END]
    log_std = out[:batch, LOGSTD_OFF:LOGSTD_END]
    mog_means = out[:batch, MOGMEAN_OFF:MOGMEAN_END].reshape(
        batch, NUM_COMPONENTS, ACTION_DIM)
    mog_log_stds = out[:batch, MOGLS_OFF:MOGLS_END].reshape(
        batch, NUM_COMPONENTS, ACTION_DIM)
    return mean, log_std, mog_means, mog_log_stds, mix_w


# ------------------------- params: init + packing -------------------------

def _xavier_uniform(key, fan_in, fan_out, gain=0.01):
    # Matches nn.init.xavier_uniform_(gain=0.01); symmetric in fan_in/fan_out.
    bound = gain * math.sqrt(6.0 / (fan_in + fan_out))
    return jax.random.uniform(
        key, (fan_in, fan_out), dtype=jnp.float32, minval=-bound, maxval=bound)


def init_params(key):
    shapes = {
        "w1": (OBS_DIM, HIDDEN),
        "w2": (HIDDEN, HIDDEN),
        "w_mean": (HIDDEN, ACTION_DIM),
        "w_logstd": (HIDDEN, ACTION_DIM),
        "w_mog_means": (HIDDEN, ACTION_DIM * NUM_COMPONENTS),
        "w_mog_logstds": (HIDDEN, ACTION_DIM * NUM_COMPONENTS),
        "w_mix": (HIDDEN, NUM_COMPONENTS),
    }
    params = {}
    keys = jax.random.split(key, len(shapes))
    for k, (name, (fi, fo)) in zip(keys, shapes.items()):
        params[name] = _xavier_uniform(k, fi, fo)
        params[name.replace("w", "b", 1)] = jnp.zeros((1, fo), dtype=jnp.float32)
    return params


def pack_params(params):
    """Concatenate the five head weights/biases into one lane-dense slab (done once)."""
    w_heads = jnp.zeros((HIDDEN, HEAD_WIDTH), dtype=jnp.float32)
    w_heads = w_heads.at[:, MIX_OFF:MIX_END].set(params["w_mix"])
    w_heads = w_heads.at[:, MEAN_OFF:MEAN_END].set(params["w_mean"])
    w_heads = w_heads.at[:, LOGSTD_OFF:LOGSTD_END].set(params["w_logstd"])
    w_heads = w_heads.at[:, MOGMEAN_OFF:MOGMEAN_END].set(params["w_mog_means"])
    w_heads = w_heads.at[:, MOGLS_OFF:MOGLS_END].set(params["w_mog_logstds"])

    b_heads = jnp.zeros((1, HEAD_WIDTH), dtype=jnp.float32)
    b_heads = b_heads.at[:, MIX_OFF:MIX_END].set(params["b_mix"])
    b_heads = b_heads.at[:, MEAN_OFF:MEAN_END].set(params["b_mean"])
    b_heads = b_heads.at[:, LOGSTD_OFF:LOGSTD_END].set(params["b_logstd"])
    b_heads = b_heads.at[:, MOGMEAN_OFF:MOGMEAN_END].set(params["b_mog_means"])
    b_heads = b_heads.at[:, MOGLS_OFF:MOGLS_END].set(params["b_mog_logstds"])

    return {
        "w1": params["w1"], "b1": params["b1"],
        "w2": params["w2"], "b2": params["b2"],
        "w_heads": w_heads, "b_heads": b_heads,
    }


# ------------------------- pure-JAX reference -------------------------

def _reference_forward(x, p):
    h = jax.nn.relu(x @ p["w1"] + p["b1"])
    h = jax.nn.relu(h @ p["w2"] + p["b2"])
    mean = h @ p["w_mean"] + p["b_mean"]
    ls = jnp.tanh(h @ p["w_logstd"] + p["b_logstd"])
    ls = LOG_STD_MIN + 0.5 * (LOG_STD_MAX - LOG_STD_MIN) * (ls + 1.0)
    mm = (h @ p["w_mog_means"] + p["b_mog_means"]).reshape(
        x.shape[0], NUM_COMPONENTS, ACTION_DIM)
    mls = jnp.clip(h @ p["w_mog_logstds"] + p["b_mog_logstds"],
                   LOG_STD_MIN, LOG_STD_MAX).reshape(
        x.shape[0], NUM_COMPONENTS, ACTION_DIM)
    logits = h @ p["w_mix"] + p["b_mix"]
    w = jax.nn.softmax(logits, axis=-1)
    w = jnp.clip(w, 1e-6, 1.0)
    w = w / jnp.sum(w, axis=-1, keepdims=True)
    return mean, ls, mm, mls, w


if __name__ == "__main__":
    key = jax.random.PRNGKey(0)
    pkey, xkey = jax.random.split(key)
    params = init_params(pkey)
    packed = pack_params(params)   # one-time weight packing; reused across calls

    # batch=8: single grid step (tile clamps to 8).  batch=96 with tile_b=32:
    # 3 grid steps, weights stay VMEM-resident across steps.
    for batch, tile_b in ((8, DEFAULT_TILE_B), (96, 32)):
        x = jax.random.normal(jax.random.fold_in(xkey, batch),
                              (batch, OBS_DIM), dtype=jnp.float32)
        outs = mog_actor_forward(x, packed, tile_b=tile_b)
        outs = jax.block_until_ready(outs)

        refs = _reference_forward(x, params)
        for o, r in zip(outs, refs):
            assert o.shape == r.shape and o.dtype == r.dtype
            assert jnp.allclose(o, r, atol=1e-4, rtol=1e-4), "mismatch vs reference"

    # TODO(synk): sample_from_mixture / get_action (multinomial + rsample) are
    # stochastic host-side paths outside forward(); not kernelized here.
    print("KERNEL_OK")
</pallas_src>

<mosaic_0001>
module attributes {stable_mosaic.version = 11 : i64} {
  func.func @_mog_actor_kernel(%arg0: i32, %arg1: memref<8x17xf32, #tpu.memory_space<vmem>>, %arg2: memref<17x256xf32, #tpu.memory_space<vmem>>, %arg3: memref<1x256xf32, #tpu.memory_space<vmem>>, %arg4: memref<256x256xf32, #tpu.memory_space<vmem>>, %arg5: memref<1x256xf32, #tpu.memory_space<vmem>>, %arg6: memref<256x128xf32, #tpu.memory_space<vmem>>, %arg7: memref<1x128xf32, #tpu.memory_space<vmem>>, %arg8: memref<8x128xf32, #tpu.memory_space<vmem>>) attributes {dimension_semantics = [#tpu.dimension_semantics<parallel>], iteration_bounds = array<i64: 1>, scalar_prefetch = 0 : i64, scratch_operands = 0 : i64, tpu.core_type = #tpu.core_type<tc>, window_params = [{transform_indices = @transform_0, window_bounds = array<i64: 8, 17>}, {pipeline_mode = #tpu.pipeline_mode<synchronous>, transform_indices = @transform_1, window_bounds = array<i64: 17, 256>}, {pipeline_mode = #tpu.pipeline_mode<synchronous>, transform_indices = @transform_2, window_bounds = array<i64: 1, 256>}, {pipeline_mode = #tpu.pipeline_mode<synchronous>, transform_indices = @transform_3, window_bounds = array<i64: 256, 256>}, {pipeline_mode = #tpu.pipeline_mode<synchronous>, transform_indices = @transform_4, window_bounds = array<i64: 1, 256>}, {pipeline_mode = #tpu.pipeline_mode<synchronous>, transform_indices = @transform_5, window_bounds = array<i64: 256, 128>}, {pipeline_mode = #tpu.pipeline_mode<synchronous>, transform_indices = @transform_6, window_bounds = array<i64: 1, 128>}, {transform_indices = @transform_7, window_bounds = array<i64: 8, 128>}]} {
    %c0 = arith.constant 0 : index
    %c0_0 = arith.constant 0 : index
    %0 = vector.load %arg1[%c0, %c0_0] : memref<8x17xf32, #tpu.memory_space<vmem>>, vector<8x17xf32>
    %c0_1 = arith.constant 0 : index
    %c0_2 = arith.constant 0 : index
    %1 = vector.load %arg2[%c0_1, %c0_2] : memref<17x256xf32, #tpu.memory_space<vmem>>, vector<17x256xf32>
    %cst = arith.constant dense<0.000000e+00> : vector<8x256xf32>
    %2 = tpu.matmul %0, %1, %cst {dimension_numbers = #tpu.dot_dimension_numbers<[1], [0], [0], [1], [0, 0, 1, 1], [], []>} : vector<8x17xf32>, vector<17x256xf32>, vector<8x256xf32> -> vector<8x256xf32>
    %c0_3 = arith.constant 0 : index
    %c0_4 = arith.constant 0 : index
    %3 = vector.load %arg3[%c0_3, %c0_4] : memref<1x256xf32, #tpu.memory_space<vmem>>, vector<1x256xf32>
    %4 = vector.broadcast %3 : vector<1x256xf32> to vector<8x256xf32>
    %5 = arith.addf %2, %4 : vector<8x256xf32>
    %cst_5 = arith.constant 0.000000e+00 : f32
    %6 = vector.broadcast %cst_5 : f32 to vector<8x256xf32>
    %7 = arith.maximumf %5, %6 : vector<8x256xf32>
    %c0_6 = arith.constant 0 : index
    %c0_7 = arith.constant 0 : index
    %8 = vector.load %arg4[%c0_6, %c0_7] : memref<256x256xf32, #tpu.memory_space<vmem>>, vector<256x256xf32>
    %cst_8 = arith.constant dense<0.000000e+00> : vector<8x256xf32>
    %9 = tpu.matmul %7, %8, %cst_8 {dimension_numbers = #tpu.dot_dimension_numbers<[1], [0], [0], [1], [0, 0, 1, 1], [], []>} : vector<8x256xf32>, vector<256x256xf32>, vector<8x256xf32> -> vector<8x256xf32>
    %c0_9 = arith.constant 0 : index
    %c0_10 = arith.constant 0 : index
    %10 = vector.load %arg5[%c0_9, %c0_10] : memref<1x256xf32, #tpu.memory_space<vmem>>, vector<1x256xf32>
    %11 = vector.broadcast %10 : vector<1x256xf32> to vector<8x256xf32>
    %12 = arith.addf %9, %11 : vector<8x256xf32>
    %cst_11 = arith.constant 0.000000e+00 : f32
    %13 = vector.broadcast %cst_11 : f32 to vector<8x256xf32>
    %14 = arith.maximumf %12, %13 : vector<8x256xf32>
    %c0_12 = arith.constant 0 : index
    %c0_13 = arith.constant 0 : index
    %15 = vector.load %arg6[%c0_12, %c0_13] : memref<256x128xf32, #tpu.memory_space<vmem>>, vector<256x128xf32>
    %cst_14 = arith.constant dense<0.000000e+00> : vector<8x128xf32>
    %16 = tpu.matmul %14, %15, %cst_14 {dimension_numbers = #tpu.dot_dimension_numbers<[1], [0], [0], [1], [0, 0, 1, 1], [], []>} : vector<8x256xf32>, vector<256x128xf32>, vector<8x128xf32> -> vector<8x128xf32>
    %c0_15 = arith.constant 0 : index
    %c0_16 = arith.constant 0 : index
    %17 = vector.load %arg7[%c0_15, %c0_16] : memref<1x128xf32, #tpu.memory_space<vmem>>, vector<1x128xf32>
    %18 = vector.broadcast %17 : vector<1x128xf32> to vector<8x128xf32>
    %19 = arith.addf %16, %18 : vector<8x128xf32>
    %20 = tpu.iota {dimensions = array<i32: 1>} : vector<8x128xi32>
    %c5_i32 = arith.constant 5 : i32
    %21 = vector.broadcast %c5_i32 : i32 to vector<8x128xi32>
    %22 = arith.cmpi slt, %20, %21 : vector<8x128xi32>
    %c11_i32 = arith.constant 11 : i32
    %23 = vector.broadcast %c11_i32 : i32 to vector<8x128xi32>
    %24 = arith.cmpi sge, %20, %23 : vector<8x128xi32>
    %c17_i32 = arith.constant 17 : i32
    %25 = vector.broadcast %c17_i32 : i32 to vector<8x128xi32>
    %26 = arith.cmpi slt, %20, %25 : vector<8x128xi32>
    %27 = arith.andi %24, %26 : vector<8x128xi1>
    %c47_i32 = arith.constant 47 : i32
    %28 = vector.broadcast %c47_i32 : i32 to vector<8x128xi32>
    %29 = arith.cmpi sge, %20, %28 : vector<8x128xi32>
    %c77_i32 = arith.constant 77 : i32
    %30 = vector.broadcast %c77_i32 : i32 to vector<8x128xi32>
    %31 = arith.cmpi slt, %20, %30 : vector<8x128xi32>
    %32 = arith.andi %29, %31 : vector<8x128xi1>
    %cst_17 = arith.constant 0xFF800000 : f32
    %33 = vector.broadcast %cst_17 : f32 to vector<8x128xf32>
    %34 = arith.select %22, %19, %33 : vector<8x128xi1>, vector<8x128xf32>
    %cst_18 = arith.constant dense<0xFF800000> : vector<8xf32>
    %35 = vector.multi_reduction <maximumf>, %34, %cst_18 [1] : vector<8x128xf32> to vector<8xf32>
    %36 = vector.shape_cast %35 : vector<8xf32> to vector<8x1xf32>
    %37 = vector.broadcast %36 : vector<8x1xf32> to vector<8x128xf32>
    %38 = arith.subf %34, %37 : vector<8x128xf32>
    %39 = math.exp %38 : vector<8x128xf32>
    %cst_19 = arith.constant dense<0.000000e+00> : vector<8xf32>
    %40 = vector.multi_reduction <add>, %39, %cst_19 [1] : vector<8x128xf32> to vector<8xf32>
    %41 = vector.shape_cast %40 : vector<8xf32> to vector<8x1xf32>
    %42 = vector.broadcast %41 : vector<8x1xf32> to vector<8x128xf32>
    %43 = arith.divf %39, %42 : vector<8x128xf32>
    %cst_20 = arith.constant 9.99999997E-7 : f32
    %cst_21 = arith.constant 1.000000e+00 : f32
    %44 = vector.broadcast %cst_20 : f32 to vector<8x128xf32>
    %45 = arith.maximumf %44, %43 : vector<8x128xf32>
    %46 = vector.broadcast %cst_21 : f32 to vector<8x128xf32>
    %47 = arith.minimumf %46, %45 : vector<8x128xf32>
    %cst_22 = arith.constant 0.000000e+00 : f32
    %48 = vector.broadcast %cst_22 : f32 to vector<8x128xf32>
    %49 = arith.select %22, %47, %48 : vector<8x128xi1>, vector<8x128xf32>
    %cst_23 = arith.constant dense<0.000000e+00> : vector<8xf32>
    %50 = vector.multi_reduction <add>, %49, %cst_23 [1] : vector<8x128xf32> to vector<8xf32>
    %51 = vector.shape_cast %50 : vector<8xf32> to vector<8x1xf32>
    %52 = vector.broadcast %51 : vector<8x1xf32> to vector<8x128xf32>
    %53 = arith.divf %49, %52 : vector<8x128xf32>
    %54 = math.tanh %19 : vector<8x128xf32>
    %cst_24 = arith.constant 1.000000e+00 : f32
    %55 = vector.broadcast %cst_24 : f32 to vector<8x128xf32>
    %56 = arith.addf %54, %55 : vector<8x128xf32>
    %cst_25 = arith.constant 3.500000e+00 : f32
    %57 = vector.broadcast %cst_25 : f32 to vector<8x128xf32>
    %58 = arith.mulf %57, %56 : vector<8x128xf32>
    %cst_26 = arith.constant -5.000000e+00 : f32
    %59 = vector.broadcast %cst_26 : f32 to vector<8x128xf32>
    %60 = arith.addf %59, %58 : vector<8x128xf32>
    %cst_27 = arith.constant -5.000000e+00 : f32
    %cst_28 = arith.constant 2.000000e+00 : f32
    %61 = vector.broadcast %cst_27 : f32 to vector<8x128xf32>
    %62 = arith.maximumf %61, %19 : vector<8x128xf32>
    %63 = vector.broadcast %cst_28 : f32 to vector<8x128xf32>
    %64 = arith.minimumf %63, %62 : vector<8x128xf32>
    %65 = arith.select %22, %53, %19 : vector<8x128xi1>, vector<8x128xf32>
    %66 = arith.select %27, %60, %65 : vector<8x128xi1>, vector<8x128xf32>
    %67 = arith.select %32, %64, %66 : vector<8x128xi1>, vector<8x128xf32>
    %c0_29 = arith.constant 0 : index
    %c0_30 = arith.constant 0 : index
    %68 = vector.load %arg8[%c0_29, %c0_30] : memref<8x128xf32, #tpu.memory_space<vmem>>, vector<8x128xf32>
    tpu.vector_store %arg8[%c0_29, %c0_30], %67 {strides = array<i32>} : memref<8x128xf32, #tpu.memory_space<vmem>>, vector<8x128xf32>,
    return
  }
  func.func @transform_0(%arg0: i32) -> (i32, i32) {
    %c0_i32 = arith.constant 0 : i32
    %c0_i32_0 = arith.constant 0 : i32
    return %arg0, %c0_i32 : i32, i32
  }
  func.func @transform_1(%arg0: i32) -> (i32, i32) {
    %c0_i32 = arith.constant 0 : i32
    %c0_i32_0 = arith.constant 0 : i32
    %c0_i32_1 = arith.constant 0 : i32
    return %c0_i32, %c0_i32_0 : i32, i32
  }
  func.func @transform_2(%arg0: i32) -> (i32, i32) {
    %c0_i32 = arith.constant 0 : i32
    %c0_i32_0 = arith.constant 0 : i32
    %c0_i32_1 = arith.constant 0 : i32
    return %c0_i32, %c0_i32_0 : i32, i32
  }
  func.func @transform_3(%arg0: i32) -> (i32, i32) {
    %c0_i32 = arith.constant 0 : i32
    %c0_i32_0 = arith.constant 0 : i32
    %c0_i32_1 = arith.constant 0 : i32
    return %c0_i32, %c0_i32_0 : i32, i32
  }
  func.func @transform_4(%arg0: i32) -> (i32, i32) {
    %c0_i32 = arith.constant 0 : i32
    %c0_i32_0 = arith.constant 0 : i32
    %c0_i32_1 = arith.constant 0 : i32
    return %c0_i32, %c0_i32_0 : i32, i32
  }
  func.func @transform_5(%arg0: i32) -> (i32, i32) {
    %c0_i32 = arith.constant 0 : i32
    %c0_i32_0 = arith.constant 0 : i32
    %c0_i32_1 = arith.constant 0 : i32
    return %c0_i32, %c0_i32_0 : i32, i32
  }
  func.func @transform_6(%arg0: i32) -> (i32, i32) {
    %c0_i32 = arith.constant 0 : i32
    %c0_i32_0 = arith.constant 0 : i32
    %c0_i32_1 = arith.constant 0 : i32
    return %c0_i32, %c0_i32_0 : i32, i32
  }
  func.func @transform_7(%arg0: i32) -> (i32, i32) {
    %c0_i32 = arith.constant 0 : i32
    %c0_i32_0 = arith.constant 0 : i32
    return %arg0, %c0_i32 : i32, i32
  }
}

</mosaic_0001>

<bundles_post_ra>
// kernel: mog_actor_forward.1
= control target key start
LH: loop header
LB: loop body
LE: loop exit
PB: predicated region body
PF: predicated region fallthrough
CT: control target
= control target key end

     0   :  { %12 = vsyncpa [#allocation3], 0  ;;  %s697_s0 = inlined_call_operand.hbm [shape: f32[8,17], index: 0, kind: input, shape index: {}]   ;;  %s698_s1 = inlined_call_operand.hbm [shape: f32[17,256], index: 1, kind: input, shape index: {}]   ;;  %s699_s2 = inlined_call_operand.vmem [shape: f32[1,256], index: 2, kind: input, shape index: {}]   ;;  %s700_s3 = inlined_call_operand.hbm [shape: f32[256,256], index: 3, kind: input, shape index: {}]   ;;  %s701_s4 = inlined_call_operand.vmem [shape: f32[1,256], index: 4, kind: input, shape index: {}]   ;;  %s702_s5 = inlined_call_operand.hbm [shape: f32[256,128], index: 5, kind: input, shape index: {}]   ;;  %s703_s6 = inlined_call_operand.hbm [shape: f32[1,128], index: 6, kind: input, shape index: {}]   ;;  %s704_s7 = inlined_call_operand.vmem [shape: f32[8,128], index: 7, kind: output, shape index: {}]  }
   0x1   :  { %13 = vsyncpa [#allocation5], 0  ;;  %s30_s26 = sshll.u32 %s698_s1, 4  ;;  %s31_s26 = int_to_ptr.hbm [resolvable:$true] %s30_s26 }
   0x2   :  { %14 = vsyncpa [#allocation8], 0  ;;  %s611_s27 = smov [#allocation4]   ;;  %s60_s8 = sshll.u32 %s702_s5, 4  ;;  %s61_s8 = int_to_ptr.hbm [resolvable:$true] %s60_s8 }
   0x3   :  { %s32_s28 = sshll.u32 %s611_s27, 4  ;;  %s612_s9 = smov 256   ;;  %s33_s28 = int_to_ptr.vmem [resolvable:$true] %s32_s28 }
   0x4   :  { %s613_s10 = smov 16   ;;  %s614_s11 = smov [#allocation7]  }
   0x5   :  { %38 = dma.hbm_to_vmem [thread:$0]  %s31_s26, 768, %s33_s28, [#allocation5], %s612_s9, %s612_s9, %s613_s10  }
   0x6   :  { %s62_s12 = sshll.u32 %s614_s11, 4  ;;  %s615_s13 = smov 128   ;;  %s63_s12 = int_to_ptr.vmem [resolvable:$true] %s62_s12 }
   0x7   :  { %s616_s14 = smov 8   ;;  %s20_s16 = sshll.u32 %s697_s0, 4  ;;  %s21_s16 = int_to_ptr.hbm [resolvable:$true] %s20_s16 }
   0x8   :  { %68 = dma.hbm_to_vmem [thread:$0]  %s61_s8, 4096, %s63_s12, [#allocation8], %s615_s13, %s615_s13, %s616_s14  }
   0x9   :  { %s617_s17 = smov [#allocation2]   ;;  %s45_s20 = sshll.u32 %s700_s3, 4  ;;  %s46_s20 = int_to_ptr.hbm [resolvable:$true] %s45_s20 }
   0xa   :  { %s22_s18 = sshll.u32 %s617_s17, 4  ;;  %s618_s21 = smov [#allocation6]   ;;  %s23_s18 = int_to_ptr.vmem [resolvable:$true] %s22_s18 }
   0xb   :  { %25 = dma.hbm_to_vmem [thread:$0]  %s21_s16, 128, %s23_s18, [#allocation3]  }
   0xc   :  { %s47_s22 = sshll.u32 %s618_s21, 4  ;;  %s74_s25 = sshll.u32 %s703_s6, 4  ;;  %s48_s22 = int_to_ptr.vmem [resolvable:$true] %s47_s22  ;;  %s75_s25 = int_to_ptr.hbm [resolvable:$true] %s74_s25 }
   0xd   :  { %53 = dma.hbm_to_vmem [thread:$0]  %s46_s20, 8192, %s48_s22, [#allocation5], %s612_s9, %s612_s9, %s613_s10  }
   0xe   :  { %s619_s0 = smov [#allocation9]  }
   0xf   :  { %s76_s26 = sshll.u32 %s619_s0, 4  ;;  %s77_s26 = int_to_ptr.vmem [resolvable:$true] %s76_s26 }
  0x10   :  { %79 = dma.hbm_to_vmem [thread:$0]  %s75_s25, 16, %s77_s26, [#allocation8]  }
  0x11   :  { %605 = dma.done.wait [#allocation3], 128  }
  0x12   :  { %606 = vsyncadd [#allocation3], 4294967168 }
  0x13   :  { %607 = dma.done.wait [#allocation5], 8960  }
  0x14   :  { %608 = vsyncadd [#allocation5], 4294958336 }
  0x15   :  { %609 = dma.done.wait [#allocation8], 4112  }
  0x16   :  { %610 = vsyncadd [#allocation8], 4294963184  ;;  %vm117_vm0 = vcmask 1040384   ;;  %v105_v0 = vld [vmem:[#allocation4 + $0x20] sm:$0x1]  ;;  %v103_v1 = vld [vmem:[#allocation4 + $0x10] sm:$0xff] }
  0x17   :  { %v106_v2 = vld [vmem:[#allocation4 + $0x28] sm:$0x1]  ;;  %463 = vmatpush.msk.msra.mxu0 %vm117_vm0, %v105_v0  ;;  %v104_v3 = vld [vmem:[#allocation4 + $0x18] sm:$0xff]  ;;  %v101_v4 = vld [vmem:[#allocation4] sm:$0xff]  ;;  %vm113_vm1 = vcmask 138240  }
  0x18   :  { %465 = vmatpush.msk.msra.mxu1 %vm117_vm0, %v106_v2  ;;  %v102_v5 = vld [vmem:[#allocation4 + $0x8] sm:$0xff]  ;;  %v196_v6 = vld [vmem:[#allocation6 + $0xf0] sm:$0xff]  ;;  %v100_v7 = vld [vmem:[#allocation2] sm:$0xff] }
  0x19   :  { %138 = vmatpush.msra.mxu0 %v103_v1  ;;  %v228_v8 = vld [vmem:[#allocation6 + $0x1f0] sm:$0xff]  ;;  %236 = vmatpush.msra.mxu2 %v196_v6  ;;  %v197_v9 = vld [vmem:[#allocation6 + $0xf8] sm:$0xff]  ;;  %v194_v10 = vld [vmem:[#allocation6 + $0xe0] sm:$0xff] }
  0x1a   :  { %158 = vmatpush.msra.mxu1 %v104_v3  ;;  %256 = vmatpush.msra.mxu3 %v228_v8  ;;  %v229_v11 = vld [vmem:[#allocation6 + $0x1f8] sm:$0xff]  ;;  %v226_v12 = vld [vmem:[#allocation6 + $0x1e0] sm:$0xff]  ;;  %v195_v13 = vld [vmem:[#allocation6 + $0xe8] sm:$0xff] }
  0x1b   :  { %139 = vmatpush.msra.mxu0 %v101_v4  ;;  %v192_v14 = vld [vmem:[#allocation6 + $0xd0] sm:$0xff]  ;;  %237 = vmatpush.msra.mxu2 %v194_v10  ;;  %v227_v15 = vld [vmem:[#allocation6 + $0x1e8] sm:$0xff]  ;;  %v193_v17 = vld [vmem:[#allocation6 + $0xd8] sm:$0xff] }
  0x1c   :  { %159 = vmatpush.msra.mxu1 %v102_v5  ;;  %464 = vmatmul.msk.f32.vlgmr.msra.gmra.mxu0 %vm113_vm1, %v100_v7  ;;  %v224_v16 = vld [vmem:[#allocation6 + $0x1d0] sm:$0xff]  ;;  %v190_v18 = vld [vmem:[#allocation6 + $0xc0] sm:$0xff]  ;;  %v225_v19 = vld [vmem:[#allocation6 + $0x1d8] sm:$0xff] }
  0x1d   :  { %466 = vmatmul.msk.f32.vlgmr.msra.gmra.mxu1 %vm113_vm1, %v100_v7  ;;  %276 = vmatpush.msrb.mxu0 %v197_v9  ;;  %v222_v20 = vld [vmem:[#allocation6 + $0x1c0] sm:$0xff]  ;;  %v191_v21 = vld [vmem:[#allocation6 + $0xc8] sm:$0xff]  ;;  %v188_v22 = vld [vmem:[#allocation6 + $0xb0] sm:$0xff] }
  0x1e   :  { %296 = vmatpush.msrb.mxu1 %v229_v11  ;;  %257 = vmatpush.msra.mxu3 %v226_v12  ;;  %v223_v23 = vld [vmem:[#allocation6 + $0x1c8] sm:$0xff]  ;;  %v220_v24 = vld [vmem:[#allocation6 + $0x1b0] sm:$0xff]  ;;  %v189_v25 = vld [vmem:[#allocation6 + $0xb8] sm:$0xff] }
  0x1f   :  { %277 = vmatpush.msrb.mxu0 %v195_v13  ;;  %238 = vmatpush.msra.mxu2 %v192_v14  ;;  %v186_v26 = vld [vmem:[#allocation6 + $0xa0] sm:$0xff]  ;;  %v221_v27 = vld [vmem:[#allocation6 + $0x1b8] sm:$0xff]  ;;  %v187_v29 = vld [vmem:[#allocation6 + $0xa8] sm:$0xff] }
  0x20   :  { %297 = vmatpush.msrb.mxu1 %v227_v15  ;;  %258 = vmatpush.msra.mxu3 %v224_v16  ;;  %v218_v28 = vld [vmem:[#allocation6 + $0x1a0] sm:$0xff]  ;;  %v184_v30 = vld [vmem:[#allocation6 + $0x90] sm:$0xff]  ;;  %v219_v31 = vld [vmem:[#allocation6 + $0x1a8] sm:$0xff] }
  0x21   :  { %278 = vmatpush.msrb.mxu0 %v193_v17  ;;  %239 = vmatpush.msra.mxu2 %v190_v18  ;;  %v216_v32 = vld [vmem:[#allocation6 + $0x190] sm:$0xff]  ;;  %v185_v33 = vld [vmem:[#allocation6 + $0x98] sm:$0xff]  ;;  %v182_v34 = vld [vmem:[#allocation6 + $0x80] sm:$0xff] }
  0x22   :  { %298 = vmatpush.msrb.mxu1 %v225_v19  ;;  %259 = vmatpush.msra.mxu3 %v222_v20  ;;  %v217_v35 = vld [vmem:[#allocation6 + $0x198] sm:$0xff]  ;;  %v214_v36 = vld [vmem:[#allocation6 + $0x180] sm:$0xff]  ;;  %v183_v37 = vld [vmem:[#allocation6 + $0x88] sm:$0xff] }
  0x23   :  { %279 = vmatpush.msrb.mxu0 %v191_v21  ;;  %240 = vmatpush.msra.mxu2 %v188_v22  ;;  %v180_v38 = vld [vmem:[#allocation6 + $0x70] sm:$0xff]  ;;  %v215_v39 = vld [vmem:[#allocation6 + $0x188] sm:$0xff]  ;;  %v181_v41 = vld [vmem:[#allocation6 + $0x78] sm:$0xff] }
  0x24   :  { %299 = vmatpush.msrb.mxu1 %v223_v23  ;;  %260 = vmatpush.msra.mxu3 %v220_v24  ;;  %v212_v40 = vld [vmem:[#allocation6 + $0x170] sm:$0xff]  ;;  %v178_v42 = vld [vmem:[#allocation6 + $0x60] sm:$0xff]  ;;  %v213_v43 = vld [vmem:[#allocation6 + $0x178] sm:$0xff] }
  0x25   :  { %280 = vmatpush.msrb.mxu0 %v189_v25  ;;  %241 = vmatpush.msra.mxu2 %v186_v26  ;;  %v210_v44 = vld [vmem:[#allocation6 + $0x160] sm:$0xff]  ;;  %v179_v45 = vld [vmem:[#allocation6 + $0x68] sm:$0xff]  ;;  %v176_v46 = vld [vmem:[#allocation6 + $0x50] sm:$0xff] }
  0x26   :  { %300 = vmatpush.msrb.mxu1 %v221_v27  ;;  %261 = vmatpush.msra.mxu3 %v218_v28  ;;  %v211_v47 = vld [vmem:[#allocation6 + $0x168] sm:$0xff]  ;;  %v208_v48 = vld [vmem:[#allocation6 + $0x150] sm:$0xff]  ;;  %v177_v49 = vld [vmem:[#allocation6 + $0x58] sm:$0xff] }
  0x27   :  { %281 = vmatpush.msrb.mxu0 %v187_v29  ;;  %242 = vmatpush.msra.mxu2 %v184_v30  ;;  %v174_v50 = vld [vmem:[#allocation6 + $0x40] sm:$0xff]  ;;  %v209_v51 = vld [vmem:[#allocation6 + $0x158] sm:$0xff]  ;;  %v175_v53 = vld [vmem:[#allocation6 + $0x48] sm:$0xff] }
  0x28   :  { %301 = vmatpush.msrb.mxu1 %v219_v31  ;;  %262 = vmatpush.msra.mxu3 %v216_v32  ;;  %v206_v52 = vld [vmem:[#allocation6 + $0x140] sm:$0xff]  ;;  %v172_v54 = vld [vmem:[#allocation6 + $0x30] sm:$0xff]  ;;  %v207_v55 = vld [vmem:[#allocation6 + $0x148] sm:$0xff] }
  0x29   :  { %282 = vmatpush.msrb.mxu0 %v185_v33  ;;  %243 = vmatpush.msra.mxu2 %v182_v34  ;;  %v173_v56 = vld [vmem:[#allocation6 + $0x38] sm:$0xff]  ;;  %v170_v57 = vld [vmem:[#allocation6 + $0x20] sm:$0xff]  ;;  %v204_v58 = vld [vmem:[#allocation6 + $0x130] sm:$0xff] }
  0x2a   :  { %302 = vmatpush.msrb.mxu1 %v217_v35  ;;  %263 = vmatpush.msra.mxu3 %v214_v36  ;;  %v171_v59 = vld [vmem:[#allocation6 + $0x28] sm:$0xff]  ;;  %v205_v60 = vld [vmem:[#allocation6 + $0x138] sm:$0xff]  ;;  %v168_v61 = vld [vmem:[#allocation6 + $0x10] sm:$0xff] }
  0x2b   :  { %283 = vmatpush.msrb.mxu0 %v183_v37  ;;  %244 = vmatpush.msra.mxu2 %v180_v38  ;;  %v202_v62 = vld [vmem:[#allocation6 + $0x120] sm:$0xff]  ;;  %v169_v63 = vld [vmem:[#allocation6 + $0x18] sm:$0xff]  ;;  %v203_v0 = vld [vmem:[#allocation6 + $0x128] sm:$0xff] }
  0x2c   :  { %303 = vmatpush.msrb.mxu1 %v215_v39  ;;  %264 = vmatpush.msra.mxu3 %v212_v40  ;;  %v166_v1 = vld [vmem:[#allocation6] sm:$0xff]  ;;  %v200_v2 = vld [vmem:[#allocation6 + $0x110] sm:$0xff]  ;;  %v167_v3 = vld [vmem:[#allocation6 + $0x8] sm:$0xff] }
  0x2d   :  { %284 = vmatpush.msrb.mxu0 %v181_v41  ;;  %245 = vmatpush.msra.mxu2 %v178_v42  ;;  %v201_v4 = vld [vmem:[#allocation6 + $0x118] sm:$0xff]  ;;  %v198_v5 = vld [vmem:[#allocation6 + $0x100] sm:$0xff]  ;;  %v199_v6 = vld [vmem:[#allocation6 + $0x108] sm:$0xff] }
  0x2e   :  { %304 = vmatpush.msrb.mxu1 %v213_v43  ;;  %265 = vmatpush.msra.mxu3 %v210_v44  ;;  %v349_v7 = vld [vmem:[#allocation7 + $0xf8] sm:$0xff]  ;;  %v348_v8 = vld [vmem:[#allocation7 + $0xf0] sm:$0xff]  ;;  %v347_v11 = vld [vmem:[#allocation7 + $0xe8] sm:$0xff] }
  0x2f   :  { %285 = vmatpush.msrb.mxu0 %v179_v45  ;;  %246 = vmatpush.msra.mxu2 %v176_v46  ;;  %v333_v9 = vld [vmem:[#allocation7 + $0x78] sm:$0xff]  ;;  %v332_v10 = vld [vmem:[#allocation7 + $0x70] sm:$0xff]  ;;  %v331_v12 = vld [vmem:[#allocation7 + $0x68] sm:$0xff] }
  0x30   :  { %305 = vmatpush.msrb.mxu1 %v211_v47  ;;  %266 = vmatpush.msra.mxu3 %v208_v48  ;;  %v346_v13 = vld [vmem:[#allocation7 + $0xe0] sm:$0xff]  ;;  %v345_v15 = vld [vmem:[#allocation7 + $0xd8] sm:$0xff]  ;;  %v344_v17 = vld [vmem:[#allocation7 + $0xd0] sm:$0xff] }
  0x31   :  { %286 = vmatpush.msrb.mxu0 %v177_v49  ;;  %247 = vmatpush.msra.mxu2 %v174_v50  ;;  %v330_v14 = vld [vmem:[#allocation7 + $0x60] sm:$0xff]  ;;  %v329_v16 = vld [vmem:[#allocation7 + $0x58] sm:$0xff]  ;;  %v328_v18 = vld [vmem:[#allocation7 + $0x50] sm:$0xff] }
  0x32   :  { %306 = vmatpush.msrb.mxu1 %v209_v51  ;;  %267 = vmatpush.msra.mxu3 %v206_v52  ;;  %v343_v19 = vld [vmem:[#allocation7 + $0xc8] sm:$0xff]  ;;  %v342_v21 = vld [vmem:[#allocation7 + $0xc0] sm:$0xff]  ;;  %v341_v23 = vld [vmem:[#allocation7 + $0xb8] sm:$0xff] }
  0x33   :  { %287 = vmatpush.msrb.mxu0 %v175_v53  ;;  %248 = vmatpush.msra.mxu2 %v172_v54  ;;  %v327_v20 = vld [vmem:[#allocation7 + $0x48] sm:$0xff]  ;;  %v326_v22 = vld [vmem:[#allocation7 + $0x40] sm:$0xff]  ;;  %v325_v24 = vld [vmem:[#allocation7 + $0x38] sm:$0xff] }
  0x34   :  { %307 = vmatpush.msrb.mxu1 %v207_v55  ;;  %268 = vmatpush.msra.mxu3 %v204_v58  ;;  %v340_v25 = vld [vmem:[#allocation7 + $0xb0] sm:$0xff]  ;;  %v339_v26 = vld [vmem:[#allocation7 + $0xa8] sm:$0xff]  ;;  %v338_v28 = vld [vmem:[#allocation7 + $0xa0] sm:$0xff] }
  0x35   :  { %288 = vmatpush.msrb.mxu0 %v173_v56  ;;  %249 = vmatpush.msra.mxu2 %v170_v57  ;;  %v107_v27 = vld [vmem:[%s699_s2] sm:$0x3]  ;;  %v324_v37 = vld [vmem:[#allocation7 + $0x30] sm:$0xff]  ;;  %v337_v38 = vld [vmem:[#allocation7 + $0x98] sm:$0xff] }
  0x36   :  { %308 = vmatpush.msrb.mxu1 %v205_v60  ;;  %269 = vmatpush.msra.mxu3 %v202_v62  ;;  %v109_v29 = vperm.slane %v107_v27, 0  ;;  %v110_v30 = vperm.slane %v107_v27, 1  ;;  %v323_v39 = vld [vmem:[#allocation7 + $0x28] sm:$0xff]  ;;  %v336_v40 = vld [vmem:[#allocation7 + $0x90] sm:$0xff]  ;;  %v322_v41 = vld [vmem:[#allocation7 + $0x20] sm:$0xff] }
  0x37   :  { %289 = vmatpush.msrb.mxu0 %v171_v59  ;;  %250 = vmatpush.msra.mxu2 %v168_v61  ;;  %v335_v42 = vld [vmem:[#allocation7 + $0x88] sm:$0xff]  ;;  %v321_v43 = vld [vmem:[#allocation7 + $0x18] sm:$0xff]  ;;  %v334_v44 = vld [vmem:[#allocation7 + $0x80] sm:$0xff]  ;;  %v394_v61 = vlaneseq }
  0x38   :  { %309 = vmatpush.msrb.mxu1 %v203_v0  ;;  %270 = vmatpush.msra.mxu3 %v200_v2  ;;  %v320_v45 = vld [vmem:[#allocation7 + $0x10] sm:$0xff]  ;;  %v319_v46 = vld [vmem:[#allocation7 + $0x8] sm:$0xff]  ;;  %v318_v47 = vld [vmem:[#allocation7] sm:$0xff] }
  0x39   :  { %290 = vmatpush.msrb.mxu0 %v169_v63  ;;  %251 = vmatpush.msra.mxu2 %v166_v1  ;;  %v230_v48 = vld [vmem:[%s701_s4] sm:$0x3]  ;;  %v476_v62 = vld [vmem:[#allocation9] ss:$0 sm:$0xff]  ;;  %v681_v63 = vand.u32 127, %v394_v61 }
  0x3a   :  { %310 = vmatpush.msrb.mxu1 %v201_v4  ;;  %271 = vmatpush.msra.mxu3 %v198_v5  ;;  %v233_v49 = vperm.slane %v230_v48, 1  ;;  %v232_v54 = vperm.slane %v230_v48, 0 }
  0x3b   :  { %291 = vmatpush.msrb.mxu0 %v167_v3  ;;  %354 = vmatpush.msrb.mxu2 %v333_v9  ;;  %vm396_vm2 = vcmp.lt.s32.totalorder %v681_v63, 5  ;;  %vm397_vm9 = vcmp.ge.s32.totalorder %v681_v63, 11  ;;  %vm398_vm10 = vcmp.lt.s32.totalorder %v681_v63, 17  ;;  %vm400_vm12 = vcmp.ge.s32.totalorder %v681_v63, 47 }
  0x3c   :  { %311 = vmatpush.msrb.mxu1 %v199_v6  ;;  %374 = vmatpush.msrb.mxu3 %v349_v7  ;;  %vm401_vm13 = vcmp.lt.s32.totalorder %v681_v63, 77  ;;  %vm399_vm15 = vmand %vm397_vm9, %vm398_vm10 }
  0x3d   :  { %355 = vmatpush.msrb.mxu2 %v332_v10  ;;  %vm402_vm0 = vmand %vm400_vm12, %vm401_vm13 }
  0x3e   :  { %375 = vmatpush.msrb.mxu3 %v348_v8 }
  0x3f   :  { %356 = vmatpush.msrb.mxu2 %v331_v12 }
  0x40   :  { %376 = vmatpush.msrb.mxu3 %v347_v11 }
  0x41   :  { %357 = vmatpush.msrb.mxu2 %v330_v14 }
  0x42   :  { %377 = vmatpush.msrb.mxu3 %v346_v13 }
  0x43   :  { %358 = vmatpush.msrb.mxu2 %v329_v16 }
  0x44   :  { %378 = vmatpush.msrb.mxu3 %v345_v15 }
  0x45   :  { %359 = vmatpush.msrb.mxu2 %v328_v18 }
  0x46   :  { %379 = vmatpush.msrb.mxu3 %v344_v17 }
  0x47   :  { %360 = vmatpush.msrb.mxu2 %v327_v20 }
  0x48   :  { %380 = vmatpush.msrb.mxu3 %v343_v19 }
  0x49   :  { %361 = vmatpush.msrb.mxu2 %v326_v22 }
  0x4a   :  { %381 = vmatpush.msrb.mxu3 %v342_v21 }
  0x4b   :  { %362 = vmatpush.msrb.mxu2 %v325_v24 }
  0x4c   :  { %382 = vmatpush.msrb.mxu3 %v341_v23 }
  0x4d   :  { %363 = vmatpush.msrb.mxu2 %v324_v37 }
  0x4e   :  { %383 = vmatpush.msrb.mxu3 %v340_v25 }
  0x4f   :  { %364 = vmatpush.msrb.mxu2 %v323_v39 }
  0x50   :  { %384 = vmatpush.msrb.mxu3 %v339_v26 }
  0x51   :  { %365 = vmatpush.msrb.mxu2 %v322_v41 }
  0x52   :  { %385 = vmatpush.msrb.mxu3 %v338_v28 }
  0x53   :  { %366 = vmatpush.msrb.mxu2 %v321_v43 }
  0x54   :  { %386 = vmatpush.msrb.mxu3 %v337_v38 }
  0x55   :  { %367 = vmatpush.msrb.mxu2 %v320_v45 }
  0x56   :  { %387 = vmatpush.msrb.mxu3 %v336_v40 }
  0x57   :  { %368 = vmatpush.msrb.mxu2 %v319_v46 }
  0x58   :  { %388 = vmatpush.msrb.mxu3 %v335_v42 }
  0x59   :  { %369 = vmatpush.msrb.mxu2 %v318_v47 }
  0x5a   :  { %389 = vmatpush.msrb.mxu3 %v334_v44 }
  0x99   :  { %v141_v31 = vpop.f32.mrf.mxu0 }
  0x9a   :  { %v161_v32 = vpop.f32.mrf.mxu1  ;;  %v142_v33 = vadd.f32 %v141_v31, %v109_v29 }
  0x9b   :  { %v162_v34 = vadd.f32 %v161_v32, %v110_v30 }
  0x9c   :  { %v164_v35 = vmax.f32 %v142_v33, 0.0 }
  0x9d   :  { %v165_v36 = vmax.f32 %v162_v34, 0.0 }
  0x9e   :  { %252 = vmatmul.f32.vlgmr.msra.gmra.mxu2 %v164_v35  ;;  %292 = vmatmul.f32.vlgmr.msrb.gmra.mxu0 %v164_v35 }
  0x9f   :  { %272 = vmatmul.f32.vlgmr.msra.gmra.mxu3 %v165_v36  ;;  %312 = vmatmul.f32.vlgmr.msrb.gmra.mxu1 %v165_v36 }
 0x11b   :  { %v293_v50 = vpop.f32.mrf.mxu0 }
 0x11c   :  { %v294_v51 = vadd.f32 %v293_v50, %v233_v49  ;;  %v313_v52 = vpop.f32.mrf.mxu1 }
 0x11e   :  { %v314_v53 = vadd.f32 %v313_v52, %v294_v51 }
 0x120   :  { %v317_v55 = vmax.f32 %v314_v53, 0.0 }
 0x121   :  { %v253_v56 = vpop.f32.mrf.mxu2 }
 0x122   :  { %v254_v57 = vadd.f32 %v253_v56, %v232_v54  ;;  %390 = vmatmul.f32.vlgmr.msrb.gmra.mxu3 %v317_v55  ;;  %v273_v58 = vpop.f32.mrf.mxu3 }
 0x124   :  { %v274_v59 = vadd.f32 %v273_v58, %v254_v57 }
 0x126   :  { %v316_v60 = vmax.f32 %v274_v59, 0.0 }
 0x128   :  { %370 = vmatmul.f32.vlgmr.msrb.gmra.mxu2 %v316_v60 }
 0x1a5   :  { %v391_v2 = vpop.f32.mrf.mxu3 }
 0x1ab   :  { %v371_v0 = vpop.f32.mrf.mxu2 }
 0x1ac   :  { %v372_v1 = vadd.f32 %v476_v62, %v371_v0 }
 0x1ae   :  { %v392_v3 = vadd.f32 %v391_v2, %v372_v1 }
 0x1b0   :  { %v403_v4 = vsel %vm396_vm2, %v392_v3, -inf  ;;  %v450_v33 = vmax.f32 %v392_v3, -5.0 }
 0x1b1   :  { %404 = vmax.xlane.f32.xlu0 %v403_v4 }
 0x1b2   :  { %v451_v41 = vmin.f32 %v450_v33, 2.0 }
 0x224   :  { %v405_v5 = vpop.xlane.xlu0 %404 }
 0x225   :  { %v406_v6 = vsub.f32 %v403_v4, %v405_v5 }
 0x227   :  { %v407_v7 = vmul.f32 1.442695, %v406_v6 }
 0x229   :  { %477 = vpow2.f32 %v407_v7 }
 0x22f   :  { %v478_v8 = vpop.eup %477 }
 0x230   :  { %409 = vadd.xlane.f32.xlu0 %v478_v8 }
 0x2a3   :  { %v410_v9 = vpop.xlane.xlu0 %409 }
 0x2a4   :  { %479 = vrcp.f32 %v410_v9  ;;  %v422_v13 = vand.u32 2147483648, %v410_v9  ;;  %v420_v15 = vand.u32 2147483647, %v410_v9  ;;  %vm416_vm4 = vweird.f32 %v410_v9 }
 0x2a6   :  { %v423_v17 = vor.u32 1.1754944e-38, %v422_v13  ;;  %vm421_vm6 = vcmp.eq.f32.partialorder %v420_v15, 8.507059e+37 }
 0x2aa   :  { %v480_v10 = vpop.eup %479 }
 0x2ab   :  { %v412_v11 = vmul.f32 %v480_v10, %v410_v9  ;;  %vm417_vm3 = vweird.f32 %v480_v10 }
 0x2ac   :  { %vm418_vm5 = vmor %vm416_vm4, %vm417_vm3 }
 0x2ad   :  { %v413_v12 = vsub.f32 1.0, %v412_v11 }
 0x2af   :  { %v414_v14 = vmul.f32 %v480_v10, %v413_v12 }
 0x2b1   :  { %v415_v16 = vadd.f32 %v480_v10, %v414_v14 }
 0x2b3   :  { %v419_v18 = vsel %vm418_vm5, %v480_v10, %v415_v16 }
 0x2b4   :  { %v424_v19 = vsel %vm421_vm6, %v423_v17, %v419_v18 }
 0x2b5   :  { %v425_v20 = vmul.f32 %v478_v8, %v424_v19 }
 0x2b7   :  { %v426_v21 = vmax.f32 %v425_v20, 1e-06 }
 0x2b9   :  { %v427_v22 = vmin.f32 %v426_v21, 1.0 }
 0x2bb   :  { %v428_v23 = vsel %vm396_vm2, %v427_v22, 0.0 }
 0x2bc   :  { %429 = vadd.xlane.f32.xlu1 %v428_v23 }
 0x32f   :  { %v430_v24 = vpop.xlane.xlu1 %429 }
 0x330   :  { %481 = vrcp.f32 %v430_v24  ;;  %v442_v30 = vand.u32 2147483648, %v430_v24  ;;  %v440_v32 = vand.u32 2147483647, %v430_v24  ;;  %vm436_vm8 = vweird.f32 %v430_v24 }
 0x331   :  { %483 = vtanh.f32 %v392_v3 }
 0x332   :  { %v443_v36 = vor.u32 1.1754944e-38, %v442_v30  ;;  %vm441_vm14 = vcmp.eq.f32.partialorder %v440_v32, 8.507059e+37 }
 0x336   :  { %v482_v25 = vpop.eup %481 }
 0x337   :  { %v484_v26 = vpop.eup %483  ;;  %v432_v27 = vmul.f32 %v482_v25, %v430_v24  ;;  %vm437_vm7 = vweird.f32 %v482_v25 }
 0x338   :  { %v447_v29 = vadd.f32 1.0, %v484_v26  ;;  %vm438_vm11 = vmor %vm436_vm8, %vm437_vm7 }
 0x339   :  { %v433_v28 = vsub.f32 1.0, %v432_v27 }
 0x33a   :  { %v448_v35 = vmul.f32 3.5, %v447_v29 }
 0x33b   :  { %v434_v31 = vmul.f32 %v482_v25, %v433_v28 }
 0x33c   :  { %v449_v40 = vadd.f32 -5.0, %v448_v35 }
 0x33d   :  { %v435_v34 = vadd.f32 %v482_v25, %v434_v31 }
 0x33f   :  { %v439_v37 = vsel %vm438_vm11, %v482_v25, %v435_v34 }
 0x340   :  { %v444_v38 = vsel %vm441_vm14, %v443_v36, %v439_v37 }
 0x341   :  { %v445_v39 = vmul.f32 %v444_v38, %v428_v23 }
 0x343   :  { %v452_v42 = vsel %vm396_vm2, %v445_v39, %v392_v3 }
 0x344   :  { %v453_v43 = vsel %vm399_vm15, %v449_v40, %v452_v42 }
 0x345   :  { %v454_v44 = vsel %vm402_vm0, %v451_v41, %v453_v43 }
 0x346   :  { %455 = vst [vmem:[%s704_s7] sm:$0xff] %v454_v44 }
 0x347   :  { %460 = vsyncpa [#allocation3], 1 }
 0x348   :  { %461 = vsyncpa [#allocation5], 1 }
 0x349   :  { %462 = vsyncpa [#allocation8], 1 }

</bundles_post_ra>
